<compile_context>
chip_gen: v5e
topology: v5e:2x2
jax: 0.10.0
libtpu: 0.0.40
codegen_flags: <defaults>
</compile_context>

<pallas_src>
import math

import jax
import jax.numpy as jnp
from jax.experimental import pallas as pl
from jax.experimental.pallas import tpu as pltpu


# ---------------------------------------------------------------------------
# Small-batch path (the module's actual regime: x1 is (1, 36)).
# Gridless single-block call; contraction on VPU/XLU (broadcast-multiply +
# lane reduce) — a (1,36)x(36,2) tile through the MXU is pure systolic
# fill/drain waste on every generation, worst on v7x's 256-wide array.
# ---------------------------------------------------------------------------
def _linear_tanh_vpu_kernel(x_ref, w_ref, b_ref, o_ref):
    # x_ref: (B, K) f32   w_ref: (N, K) f32 (PyTorch Linear layout)
    # b_ref: (1, N) f32   o_ref: (B, N) f32      -- all VMEM
    x = x_ref[...]
    w = w_ref[...]
    acc = jnp.sum(x[:, None, :] * w[None, :, :], axis=-1)        # (B, N) f32
    o_ref[...] = jnp.tanh(acc + b_ref[...]).astype(o_ref.dtype)  # EUP tanh


# ---------------------------------------------------------------------------
# Batched path: once B amortizes the fixed launch/DMA cost and fills the MXU,
# do the contraction on the MXU with a B-tile "parallel" grid.
# ---------------------------------------------------------------------------
def _linear_tanh_mxu_kernel(x_ref, wt_ref, b_ref, o_ref):
    # x_ref: (tb, K)  wt_ref: (K, N)  b_ref: (1, N)  o_ref: (tb, N)
    acc = jnp.dot(x_ref[...], wt_ref[...],
                  preferred_element_type=jnp.float32)            # (tb, N)
    o_ref[...] = jnp.tanh(acc + b_ref[...]).astype(o_ref.dtype)


# Switch point: MXU pays off roughly when the batch fills the systolic array
# (~128 rows on v5e's 4x128^2, ~256 on v6e/v7x's 2x256^2).
_MXU_BATCH_THRESHOLD = 256


def linear_tanh(x, w, b):
    """tanh(x @ w.T + b).  x: (B, 36) f32, w: (2, 36) PyTorch layout, b: (2,)."""
    B, K = x.shape
    N, K2 = w.shape
    assert K == K2 and b.shape == (N,)
    b_row = b.reshape(1, N)

    # Advisory hint: tells XLA this custom call is trivially cheap so it does
    # not serialize neighboring fusions around it.
    cost = pl.CostEstimate(
        flops=2 * B * K * N,
        transcendentals=B * N,
        bytes_accessed=4 * (B * K + N * K + N + B * N),
    )

    if B >= _MXU_BATCH_THRESHOLD and B % 128 == 0:
        tb = 256 if B % 256 == 0 else 128
        return pl.pallas_call(
            _linear_tanh_mxu_kernel,
            out_shape=jax.ShapeDtypeStruct((B, N), x.dtype),
            grid=(B // tb,),
            in_specs=[
                pl.BlockSpec((tb, K), lambda i: (i, 0)),   # x tile
                pl.BlockSpec((K, N), lambda i: (0, 0)),    # w.T, resident
                pl.BlockSpec((1, N), lambda i: (0, 0)),    # bias, resident
            ],
            out_specs=pl.BlockSpec((tb, N), lambda i: (i, 0)),
            compiler_params=pltpu.CompilerParams(
                dimension_semantics=("parallel",)),
            cost_estimate=cost,
        )(x, w.T, b_row)

    # Gridless single-block call: whole arrays live in VMEM, no pipeline
    # prologue/epilogue, no per-step grid overhead.  f32 end-to-end.
    return pl.pallas_call(
        _linear_tanh_vpu_kernel,
        out_shape=jax.ShapeDtypeStruct((B, N), x.dtype),
        in_specs=[
            pl.BlockSpec(memory_space=pltpu.MemorySpace.VMEM),   # x
            pl.BlockSpec(memory_space=pltpu.MemorySpace.VMEM),   # w
            pl.BlockSpec(memory_space=pltpu.MemorySpace.VMEM),   # bias
        ],
        out_specs=pl.BlockSpec(memory_space=pltpu.MemorySpace.VMEM),
        cost_estimate=cost,
    )(x, w, b_row)


if __name__ == "__main__":
    key = jax.random.PRNGKey(0)
    kx, kw, kb, kxb = jax.random.split(key, 4)

    in_features, out_features = 36, 2

    # Deterministic parameters for Linear(36, 2); weight kept in the PyTorch
    # native (out_features, in_features) layout, U(-1/sqrt(36), 1/sqrt(36)).
    bound = 1.0 / math.sqrt(in_features)
    w = jax.random.uniform(kw, (out_features, in_features),
                           dtype=jnp.float32, minval=-bound, maxval=bound)
    b = jax.random.uniform(kb, (out_features,),
                           dtype=jnp.float32, minval=-bound, maxval=bound)

    # --- Spec shape from the module: x1 = torch.randn(1, 36) --------------
    x1 = jax.random.normal(kx, (1, in_features), dtype=jnp.float32)
    out1 = linear_tanh(x1, w, b)
    jax.block_until_ready(out1)
    ref1 = jnp.tanh(x1 @ w.T + b)
    assert out1.shape == (1, out_features)
    assert jnp.allclose(out1, ref1, atol=1e-5), "mismatch vs reference (B=1)"

    # --- Batched call: amortizes the fixed launch/DMA cost and exercises ---
    # --- the MXU path (review items 1 & 4). --------------------------------
    xb = jax.random.normal(kxb, (512, in_features), dtype=jnp.float32)
    outb = linear_tanh(xb, w, b)
    jax.block_until_ready(outb)
    refb = jnp.tanh(xb @ w.T + b)
    # Looser tolerance: the MXU f32 contraction may be lowered as multi-pass
    # bf16 depending on generation/precision defaults.
    assert outb.shape == (512, out_features)
    assert jnp.allclose(outb, refb, atol=5e-3), "mismatch vs reference (B=512)"

    print("KERNEL_OK")
</pallas_src>

<mosaic_0001>
module attributes {stable_mosaic.version = 11 : i64} {
  func.func @_linear_tanh_vpu_kernel(%arg0: memref<1x36xf32, #tpu.memory_space<vmem>>, %arg1: memref<2x36xf32, #tpu.memory_space<vmem>>, %arg2: memref<1x2xf32, #tpu.memory_space<vmem>>, %arg3: memref<1x2xf32, #tpu.memory_space<vmem>>) attributes {dimension_semantics = [], scalar_prefetch = 0 : i64, scratch_operands = 0 : i64, tpu.core_type = #tpu.core_type<tc>} {
    %c0 = arith.constant 0 : index
    %c0_0 = arith.constant 0 : index
    %0 = vector.load %arg0[%c0, %c0_0] : memref<1x36xf32, #tpu.memory_space<vmem>>, vector<1x36xf32>
    %c0_1 = arith.constant 0 : index
    %c0_2 = arith.constant 0 : index
    %1 = vector.load %arg1[%c0_1, %c0_2] : memref<2x36xf32, #tpu.memory_space<vmem>>, vector<2x36xf32>
    %2 = vector.shape_cast %0 : vector<1x36xf32> to vector<1x1x36xf32>
    %3 = vector.shape_cast %1 : vector<2x36xf32> to vector<1x2x36xf32>
    %4 = vector.broadcast %2 : vector<1x1x36xf32> to vector<1x2x36xf32>
    %5 = arith.mulf %4, %3 : vector<1x2x36xf32>
    %cst = arith.constant dense<0.000000e+00> : vector<1x2xf32>
    %6 = vector.multi_reduction <add>, %5, %cst [2] : vector<1x2x36xf32> to vector<1x2xf32>
    %c0_3 = arith.constant 0 : index
    %c0_4 = arith.constant 0 : index
    %7 = vector.load %arg2[%c0_3, %c0_4] : memref<1x2xf32, #tpu.memory_space<vmem>>, vector<1x2xf32>
    %8 = arith.addf %6, %7 : vector<1x2xf32>
    %9 = math.tanh %8 : vector<1x2xf32>
    %c0_5 = arith.constant 0 : index
    %c0_6 = arith.constant 0 : index
    %10 = vector.load %arg3[%c0_5, %c0_6] : memref<1x2xf32, #tpu.memory_space<vmem>>, vector<1x2xf32>
    tpu.vector_store %arg3[%c0_5, %c0_6], %9 {strides = array<i32>} : memref<1x2xf32, #tpu.memory_space<vmem>>, vector<1x2xf32>,
    return
  }
}

</mosaic_0001>

<bundles_post_ra>
// kernel: tpu_custom_call.1
= control target key start
LH: loop header
LB: loop body
LE: loop exit
PB: predicated region body
PF: predicated region fallthrough
CT: control target
= control target key end

     0   :  { %8 = vsyncpa [#allocation3], 0  ;;  %s218_s0 = inlined_call_operand.hbm [shape: f32[1,36], index: 0, kind: input, shape index: {}]   ;;  %s219_s1 = inlined_call_operand.hbm [shape: f32[2,36], index: 1, kind: input, shape index: {}]   ;;  %s220_s2 = inlined_call_operand.vmem [shape: f32[1,2], index: 2, kind: input, shape index: {}]   ;;  %s221_s3 = inlined_call_operand.hbm [shape: f32[1,2], index: 3, kind: output, shape index: {}]  }
   0x1   :  { %9 = vsyncpa [#allocation6], 0 }
   0x2   :  { %10 = vsyncpa [#allocation4], 0  ;;  %s16_s14 = sshll.u32 %s218_s0, 4  ;;  %s182_s15 = smov [#allocation2]   ;;  %s17_s14 = int_to_ptr.hbm [resolvable:$true] %s16_s14 }
   0x3   :  { %s18_s16 = sshll.u32 %s182_s15, 4  ;;  %s27_s19 = sshll.u32 %s219_s1, 4  ;;  %s19_s16 = int_to_ptr.vmem [resolvable:$true] %s18_s16  ;;  %s28_s19 = int_to_ptr.hbm [resolvable:$true] %s27_s19 }
   0x4   :  { %21 = dma.hbm_to_vmem [thread:$0]  %s17_s14, 16, %s19_s16, [#allocation3]  }
   0x5   :  { %s183_s20 = smov [#allocation5]  }
   0x6   :  { %s29_s21 = sshll.u32 %s183_s20, 4  ;;  %s30_s21 = int_to_ptr.vmem [resolvable:$true] %s29_s21 }
   0x7   :  { %32 = dma.hbm_to_vmem [thread:$0]  %s28_s19, 32, %s30_s21, [#allocation6]  }
   0x8   :  { %176 = dma.done.wait [#allocation3], 16  }
   0x9   :  { %177 = vsyncadd [#allocation3], 4294967280 }
   0xa   :  { %178 = dma.done.wait [#allocation6], 32  }
   0xb   :  { %179 = vsyncadd [#allocation6], 4294967264  ;;  %v56_v0 = vlaneseq  ;;  %v44_v2 = vld [vmem:[#allocation5] sm:$0x3]  ;;  %v100_v3 = vld [vmem:[#allocation2] ss:$0 sm:$0xff] }
   0xc   :  { %vm49_vm0 = vcmask 287744   ;;  %v48_v4 = vmul.f32 %v100_v3, %v44_v2  ;;  %v101_v6 = vld [vmem:[%s220_s2] ss:$0 sm:$0xff]  ;;  %v184_v7 = vmov 0   ;;  %s185_s22 = smov [#allocation7]   ;;  %s82_s26 = sshll.u32 %s221_s3, 4  ;;  %s83_s26 = int_to_ptr.hbm [resolvable:$true] %s82_s26 }
   0xd   :  { %v57_v1 = vshrl.u32 %v56_v0, 7  ;;  %98 = vset.pattern.permute.xlu1 %v184_v7  ;;  %v70_v12 = vand.u32 127, %v56_v0  ;;  %s80_s23 = sshll.u32 %s185_s22, 4  ;;  %vm73_vm1 = vcmask 8192   ;;  %s81_s23 = int_to_ptr.vmem [resolvable:$true] %s80_s23 }
   0xe   :  { %v50_v5 = vsel %vm49_vm0, %v48_v4, 0.0 }
   0xf   :  { %97 = vset.pattern.permute.xlu0 %v57_v1 }
  0x10   :  { %51 = vadd.xlane.f32.xlu0 %v50_v5 }
  0x24   :  { %60 = vperm.xlu0 %97, %v101_v6  }
  0x2c   :  { %99 = vset.pattern.permute.xlu0 %v184_v7 }
  0x83   :  { %v52_v8 = vpop.xlane.xlu0 %51 }
  0x96   :  { %v61_v9 = vpop.permute.xlu0 %60 }
  0x97   :  { %v63_v10 = vadd.f32 %v61_v9, %v52_v8 }
  0x99   :  { %102 = vtanh.f32 %v63_v10 }
  0x9f   :  { %v103_v11 = vpop.eup %102 }
  0xa0   :  { %67 = vperm.xlu1 %98, %v103_v11  }
 0x112   :  { %v68_v13 = vpop.permute.xlu1 %67 }
 0x113   :  { %v71_v14 = vperm.slane %v68_v13, %v70_v12 }
 0x115   :  { %74 = vst.msk [vmem:[#allocation7] sm:$0x1] %vm73_vm1, %v71_v14 }
 0x116   :  { %85 = dma.vmem_to_hbm [thread:$0]  %s81_s23, 16, %s83_s26, [#allocation4]  }
 0x117   :  { %180 = dma.done.wait [#allocation4], 16  }
 0x118   :  { %181 = vsyncadd [#allocation4], 4294967280 }
 0x119   :  { %90 = vsyncpa [#allocation3], 1 }
 0x11a   :  { %91 = vsyncpa [#allocation6], 1 }
 0x11b   :  { %92 = vsyncpa [#allocation4], 1 }

</bundles_post_ra>
